<compile_context>
chip_gen: v5e
topology: v5e:2x2
jax: 0.10.0
libtpu: 0.0.40
codegen_flags: <defaults>
</compile_context>

<pallas_src>
import numpy as np
import jax
import jax.numpy as jnp
from jax.experimental import pallas as pl
from jax.experimental.pallas import tpu as pltpu

LANE = 128          # TPU lane width; all feature dims are padded to this
HIDDEN = 64         # logical hidden width of fc1 / fc2
TILE_B_MAX = 512    # batch tile rows; comfortably inside v7x's 64 MiB VMEM
                    # with double-buffered x (bf16) / out (f32) tiles


def _round_up(x, m):
    return (x + m - 1) // m * m


def _orthogonal(key, shape, gain=1.0, dtype=jnp.float32):
    """Orthogonal init following torch.nn.init.orthogonal_ semantics
    (QR of the rows x cols normal matrix, sign-fixed). RNG stream differs
    from PyTorch, so values are not bit-identical — distributionally matched."""
    rows, cols = shape
    a = jax.random.normal(key, (rows, cols), dtype=jnp.float32)
    if rows < cols:
        a = a.T
    q, r = jnp.linalg.qr(a)
    d = jnp.diagonal(r)
    q = q * jnp.where(d == 0, 1.0, jnp.sign(d))[None, :]
    if rows < cols:
        q = q.T
    return (gain * q).astype(dtype)


def init_ppo_params(key, state_dim, action_dim):
    """Parameters mirroring PPOAgent.__init__/_init_weights.
    Weights stored [in, out] (transposed vs nn.Linear.weight); biases zero."""
    k1, k2, k3 = jax.random.split(key, 3)
    w1 = _orthogonal(k1, (HIDDEN, state_dim)).T      # [state_dim, 64]
    w2 = _orthogonal(k2, (HIDDEN, HIDDEN)).T         # [64, 64]
    w3 = _orthogonal(k3, (action_dim, HIDDEN)).T     # [64, action_dim]
    b1 = jnp.zeros((HIDDEN,), jnp.float32)
    b2 = jnp.zeros((HIDDEN,), jnp.float32)
    b3 = jnp.zeros((action_dim,), jnp.float32)
    # log_std exists in the module but is unused by forward().
    return (w1, b1, w2, b2, w3, b3)


def _pad_params(params):
    """Zero-pad all feature dims to LANE and cast weights to bf16 (MXU input);
    biases stay f32 [1, LANE] since they are added to the f32 accumulator."""
    w1, b1, w2, b2, w3, b3 = params

    def pad_w(w):
        i, o = w.shape
        return jnp.pad(w, ((0, LANE - i), (0, LANE - o))).astype(jnp.bfloat16)

    def pad_b(b):
        return jnp.pad(b, (0, LANE - b.shape[0])).astype(jnp.float32)[None, :]

    return (pad_w(w1), pad_b(b1), pad_w(w2), pad_b(b2), pad_w(w3), pad_b(b3))


def ppo_mlp_kernel(x_ref, w1_ref, b1_ref, w2_ref, b2_ref, w3_ref, b3_ref, out_ref):
    """Fused MLP on one batch tile: relu(relu(x@W1+b1)@W2+b2)@W3+b3.

    bf16 MXU inputs, f32 accumulation + bias + ReLU, f32 lane-dense store.
    Zero-padded columns stay zero through every layer, so padding is exact.
    """
    x = x_ref[...]                                               # bf16 [TB, 128]

    h1 = jnp.dot(x, w1_ref[...], preferred_element_type=jnp.float32) + b1_ref[...]
    h1 = jnp.maximum(h1, 0.0).astype(jnp.bfloat16)               # relu1

    h2 = jnp.dot(h1, w2_ref[...], preferred_element_type=jnp.float32) + b2_ref[...]
    h2 = jnp.maximum(h2, 0.0).astype(jnp.bfloat16)               # relu2

    mean = jnp.dot(h2, w3_ref[...], preferred_element_type=jnp.float32) + b3_ref[...]
    out_ref[...] = mean.astype(out_ref.dtype)
    # TODO(synk): the PyTorch forward()'s print() debug calls are omitted.


def ppo_agent_forward(x, params):
    """PPOAgent.forward(x) -> mean.  x: [B, state_dim] float32."""
    w1p, b1p, w2p, b2p, w3p, b3p = _pad_params(params)
    B, state_dim = x.shape
    action_dim = params[4].shape[1]

    tile_b = min(TILE_B_MAX, _round_up(B, 8))
    B_pad = _round_up(B, tile_b)
    num_tiles = B_pad // tile_b

    x_pad = jnp.pad(x.astype(jnp.bfloat16),
                    ((0, B_pad - B), (0, LANE - state_dim)))

    # x / out stream through the grid (tiled on batch); weights & biases use a
    # constant index_map so they are loaded once and stay VMEM-resident.
    x_spec = pl.BlockSpec((tile_b, LANE), lambda i: (i, 0))
    w_spec = pl.BlockSpec((LANE, LANE), lambda i: (0, 0))
    b_spec = pl.BlockSpec((1, LANE), lambda i: (0, 0))
    out_spec = pl.BlockSpec((tile_b, LANE), lambda i: (i, 0))

    out_pad = pl.pallas_call(
        ppo_mlp_kernel,
        out_shape=jax.ShapeDtypeStruct((B_pad, LANE), jnp.float32),
        grid=(num_tiles,),
        in_specs=[x_spec, w_spec, b_spec, w_spec, b_spec, w_spec, b_spec],
        out_specs=out_spec,
        compiler_params=pltpu.CompilerParams(
            dimension_semantics=("parallel",)),
    )(x_pad, w1p, b1p, w2p, b2p, w3p, b3p)

    return out_pad[:B, :action_dim]


if __name__ == "__main__":
    state_dim = 16
    action_dim = 8
    batch = 8

    key = jax.random.PRNGKey(0)
    k_params, k_x = jax.random.split(key)

    params = init_ppo_params(k_params, state_dim, action_dim)
    x = jax.random.normal(k_x, (batch, state_dim), dtype=jnp.float32)

    mean = jax.block_until_ready(ppo_agent_forward(x, params))
    assert mean.shape == (batch, action_dim)

    # Reference 1: mirrors the kernel's bf16-input / f32-accumulate arithmetic.
    w1, b1, w2, b2, w3, b3 = params
    bf = lambda a: a.astype(jnp.bfloat16).astype(jnp.float32)
    h1 = jnp.maximum(bf(x) @ bf(w1) + b1[None, :], 0.0)
    h2 = jnp.maximum(bf(h1) @ bf(w2) + b2[None, :], 0.0)
    ref_bf16 = bf(h2) @ bf(w3) + b3[None, :]
    np.testing.assert_allclose(np.asarray(mean), np.asarray(ref_bf16),
                               rtol=1e-3, atol=1e-3)

    # Reference 2: loose sanity check vs. full-f32 math.
    h1f = jnp.maximum(x @ w1 + b1[None, :], 0.0)
    h2f = jnp.maximum(h1f @ w2 + b2[None, :], 0.0)
    ref_f32 = h2f @ w3 + b3[None, :]
    np.testing.assert_allclose(np.asarray(mean), np.asarray(ref_f32),
                               rtol=5e-2, atol=5e-2)

    print("KERNEL_OK")
</pallas_src>

<mosaic_0001>
module attributes {stable_mosaic.version = 11 : i64} {
  func.func @ppo_mlp_kernel(%arg0: i32, %arg1: memref<8x128xbf16, #tpu.memory_space<vmem>>, %arg2: memref<128x128xbf16, #tpu.memory_space<vmem>>, %arg3: memref<1x128xf32, #tpu.memory_space<vmem>>, %arg4: memref<128x128xbf16, #tpu.memory_space<vmem>>, %arg5: memref<1x128xf32, #tpu.memory_space<vmem>>, %arg6: memref<128x128xbf16, #tpu.memory_space<vmem>>, %arg7: memref<1x128xf32, #tpu.memory_space<vmem>>, %arg8: memref<8x128xf32, #tpu.memory_space<vmem>>) attributes {dimension_semantics = [#tpu.dimension_semantics<parallel>], iteration_bounds = array<i64: 1>, scalar_prefetch = 0 : i64, scratch_operands = 0 : i64, tpu.core_type = #tpu.core_type<tc>, window_params = [{transform_indices = @transform_0, window_bounds = array<i64: 8, 128>}, {pipeline_mode = #tpu.pipeline_mode<synchronous>, transform_indices = @transform_1, window_bounds = array<i64: 128, 128>}, {pipeline_mode = #tpu.pipeline_mode<synchronous>, transform_indices = @transform_2, window_bounds = array<i64: 1, 128>}, {pipeline_mode = #tpu.pipeline_mode<synchronous>, transform_indices = @transform_3, window_bounds = array<i64: 128, 128>}, {pipeline_mode = #tpu.pipeline_mode<synchronous>, transform_indices = @transform_4, window_bounds = array<i64: 1, 128>}, {pipeline_mode = #tpu.pipeline_mode<synchronous>, transform_indices = @transform_5, window_bounds = array<i64: 128, 128>}, {pipeline_mode = #tpu.pipeline_mode<synchronous>, transform_indices = @transform_6, window_bounds = array<i64: 1, 128>}, {transform_indices = @transform_7, window_bounds = array<i64: 8, 128>}]} {
    %c0 = arith.constant 0 : index
    %c0_0 = arith.constant 0 : index
    %0 = vector.load %arg1[%c0, %c0_0] : memref<8x128xbf16, #tpu.memory_space<vmem>>, vector<8x128xbf16>
    %c0_1 = arith.constant 0 : index
    %c0_2 = arith.constant 0 : index
    %1 = vector.load %arg2[%c0_1, %c0_2] : memref<128x128xbf16, #tpu.memory_space<vmem>>, vector<128x128xbf16>
    %cst = arith.constant dense<0.000000e+00> : vector<8x128xf32>
    %2 = tpu.matmul %0, %1, %cst {dimension_numbers = #tpu.dot_dimension_numbers<[1], [0], [0], [1], [0, 0, 1, 1], [], []>} : vector<8x128xbf16>, vector<128x128xbf16>, vector<8x128xf32> -> vector<8x128xf32>
    %c0_3 = arith.constant 0 : index
    %c0_4 = arith.constant 0 : index
    %3 = vector.load %arg3[%c0_3, %c0_4] : memref<1x128xf32, #tpu.memory_space<vmem>>, vector<1x128xf32>
    %4 = vector.broadcast %3 : vector<1x128xf32> to vector<8x128xf32>
    %5 = arith.addf %2, %4 : vector<8x128xf32>
    %cst_5 = arith.constant 0.000000e+00 : f32
    %6 = vector.broadcast %cst_5 : f32 to vector<8x128xf32>
    %7 = arith.maximumf %5, %6 : vector<8x128xf32>
    %8 = arith.truncf %7 : vector<8x128xf32> to vector<8x128xbf16>
    %c0_6 = arith.constant 0 : index
    %c0_7 = arith.constant 0 : index
    %9 = vector.load %arg4[%c0_6, %c0_7] : memref<128x128xbf16, #tpu.memory_space<vmem>>, vector<128x128xbf16>
    %cst_8 = arith.constant dense<0.000000e+00> : vector<8x128xf32>
    %10 = tpu.matmul %8, %9, %cst_8 {dimension_numbers = #tpu.dot_dimension_numbers<[1], [0], [0], [1], [0, 0, 1, 1], [], []>} : vector<8x128xbf16>, vector<128x128xbf16>, vector<8x128xf32> -> vector<8x128xf32>
    %c0_9 = arith.constant 0 : index
    %c0_10 = arith.constant 0 : index
    %11 = vector.load %arg5[%c0_9, %c0_10] : memref<1x128xf32, #tpu.memory_space<vmem>>, vector<1x128xf32>
    %12 = vector.broadcast %11 : vector<1x128xf32> to vector<8x128xf32>
    %13 = arith.addf %10, %12 : vector<8x128xf32>
    %cst_11 = arith.constant 0.000000e+00 : f32
    %14 = vector.broadcast %cst_11 : f32 to vector<8x128xf32>
    %15 = arith.maximumf %13, %14 : vector<8x128xf32>
    %16 = arith.truncf %15 : vector<8x128xf32> to vector<8x128xbf16>
    %c0_12 = arith.constant 0 : index
    %c0_13 = arith.constant 0 : index
    %17 = vector.load %arg6[%c0_12, %c0_13] : memref<128x128xbf16, #tpu.memory_space<vmem>>, vector<128x128xbf16>
    %cst_14 = arith.constant dense<0.000000e+00> : vector<8x128xf32>
    %18 = tpu.matmul %16, %17, %cst_14 {dimension_numbers = #tpu.dot_dimension_numbers<[1], [0], [0], [1], [0, 0, 1, 1], [], []>} : vector<8x128xbf16>, vector<128x128xbf16>, vector<8x128xf32> -> vector<8x128xf32>
    %c0_15 = arith.constant 0 : index
    %c0_16 = arith.constant 0 : index
    %19 = vector.load %arg7[%c0_15, %c0_16] : memref<1x128xf32, #tpu.memory_space<vmem>>, vector<1x128xf32>
    %20 = vector.broadcast %19 : vector<1x128xf32> to vector<8x128xf32>
    %21 = arith.addf %18, %20 : vector<8x128xf32>
    %c0_17 = arith.constant 0 : index
    %c0_18 = arith.constant 0 : index
    %22 = vector.load %arg8[%c0_17, %c0_18] : memref<8x128xf32, #tpu.memory_space<vmem>>, vector<8x128xf32>
    tpu.vector_store %arg8[%c0_17, %c0_18], %21 {strides = array<i32>} : memref<8x128xf32, #tpu.memory_space<vmem>>, vector<8x128xf32>,
    return
  }
  func.func @transform_0(%arg0: i32) -> (i32, i32) {
    %c0_i32 = arith.constant 0 : i32
    %c0_i32_0 = arith.constant 0 : i32
    return %arg0, %c0_i32 : i32, i32
  }
  func.func @transform_1(%arg0: i32) -> (i32, i32) {
    %c0_i32 = arith.constant 0 : i32
    %c0_i32_0 = arith.constant 0 : i32
    %c0_i32_1 = arith.constant 0 : i32
    return %c0_i32, %c0_i32_0 : i32, i32
  }
  func.func @transform_2(%arg0: i32) -> (i32, i32) {
    %c0_i32 = arith.constant 0 : i32
    %c0_i32_0 = arith.constant 0 : i32
    %c0_i32_1 = arith.constant 0 : i32
    return %c0_i32, %c0_i32_0 : i32, i32
  }
  func.func @transform_3(%arg0: i32) -> (i32, i32) {
    %c0_i32 = arith.constant 0 : i32
    %c0_i32_0 = arith.constant 0 : i32
    %c0_i32_1 = arith.constant 0 : i32
    return %c0_i32, %c0_i32_0 : i32, i32
  }
  func.func @transform_4(%arg0: i32) -> (i32, i32) {
    %c0_i32 = arith.constant 0 : i32
    %c0_i32_0 = arith.constant 0 : i32
    %c0_i32_1 = arith.constant 0 : i32
    return %c0_i32, %c0_i32_0 : i32, i32
  }
  func.func @transform_5(%arg0: i32) -> (i32, i32) {
    %c0_i32 = arith.constant 0 : i32
    %c0_i32_0 = arith.constant 0 : i32
    %c0_i32_1 = arith.constant 0 : i32
    return %c0_i32, %c0_i32_0 : i32, i32
  }
  func.func @transform_6(%arg0: i32) -> (i32, i32) {
    %c0_i32 = arith.constant 0 : i32
    %c0_i32_0 = arith.constant 0 : i32
    %c0_i32_1 = arith.constant 0 : i32
    return %c0_i32, %c0_i32_0 : i32, i32
  }
  func.func @transform_7(%arg0: i32) -> (i32, i32) {
    %c0_i32 = arith.constant 0 : i32
    %c0_i32_0 = arith.constant 0 : i32
    return %arg0, %c0_i32 : i32, i32
  }
}

</mosaic_0001>

<bundles_post_ra>
// kernel: tpu_custom_call.1
= control target key start
LH: loop header
LB: loop body
LE: loop exit
PB: predicated region body
PF: predicated region fallthrough
CT: control target
= control target key end

     0   :  { %12 = vsyncpa [#allocation3], 0  ;;  %s685_s0 = inlined_call_operand.hbm [shape: bf16[8,128], index: 0, kind: input, shape index: {}]   ;;  %s686_s1 = inlined_call_operand.hbm [shape: bf16[128,128], index: 1, kind: input, shape index: {}]   ;;  %s687_s2 = inlined_call_operand.vmem [shape: f32[1,128], index: 2, kind: input, shape index: {}]   ;;  %s688_s3 = inlined_call_operand.hbm [shape: bf16[128,128], index: 3, kind: input, shape index: {}]   ;;  %s689_s4 = inlined_call_operand.vmem [shape: f32[1,128], index: 4, kind: input, shape index: {}]   ;;  %s690_s5 = inlined_call_operand.hbm [shape: bf16[128,128], index: 5, kind: input, shape index: {}]   ;;  %s691_s6 = inlined_call_operand.vmem [shape: f32[1,128], index: 6, kind: input, shape index: {}]   ;;  %s692_s7 = inlined_call_operand.hbm [shape: f32[8,128], index: 7, kind: output, shape index: {}]  }
   0x1   :  { %13 = vsyncpa [#allocation6], 0 }
   0x2   :  { %14 = vsyncpa [#allocation9], 0  ;;  %s31_s26 = sshll.u32 %s686_s1, 4  ;;  %s32_s26 = int_to_ptr.hbm [resolvable:$true] %s31_s26 }
   0x3   :  { %15 = vsyncpa [#allocation4], 0  ;;  %s614_s27 = smov [#allocation5]   ;;  %s21_s8 = sshll.u32 %s685_s0, 4  ;;  %s22_s8 = int_to_ptr.hbm [resolvable:$true] %s21_s8 }
   0x4   :  { %s33_s28 = sshll.u32 %s614_s27, 4  ;;  %s615_s9 = smov 64   ;;  %s34_s28 = int_to_ptr.vmem [resolvable:$true] %s33_s28 }
   0x5   :  { %s616_s10 = smov 4   ;;  %s617_s11 = smov [#allocation2]  }
   0x6   :  { %39 = dma.hbm_to_vmem [thread:$0]  %s32_s26, 1024, %s34_s28, [#allocation6], %s615_s9, %s615_s9, %s616_s10  }
   0x7   :  { %s23_s12 = sshll.u32 %s617_s11, 4  ;;  %s46_s15 = sshll.u32 %s688_s3, 4  ;;  %s24_s12 = int_to_ptr.vmem [resolvable:$true] %s23_s12  ;;  %s47_s15 = int_to_ptr.hbm [resolvable:$true] %s46_s15 }
   0x8   :  { %26 = dma.hbm_to_vmem [thread:$0]  %s22_s8, 64, %s24_s12, [#allocation3]  }
   0x9   :  { %s61_s17 = sshll.u32 %s690_s5, 4  ;;  %s618_s18 = smov [#allocation7]   ;;  %s62_s17 = int_to_ptr.hbm [resolvable:$true] %s61_s17 }
   0xa   :  { %s48_s19 = sshll.u32 %s618_s18, 4  ;;  %s619_s0 = smov [#allocation8]   ;;  %s49_s19 = int_to_ptr.vmem [resolvable:$true] %s48_s19 }
   0xb   :  { %54 = dma.hbm_to_vmem [thread:$0]  %s47_s15, 1024, %s49_s19, [#allocation6], %s615_s9, %s615_s9, %s616_s10  }
   0xc   :  { %s63_s20 = sshll.u32 %s619_s0, 4  ;;  %s64_s20 = int_to_ptr.vmem [resolvable:$true] %s63_s20 }
   0xd   :  { %69 = dma.hbm_to_vmem [thread:$0]  %s62_s17, 1024, %s64_s20, [#allocation9], %s615_s9, %s615_s9, %s616_s10  }
   0xe   :  { %606 = dma.done.wait [#allocation3], 64  }
   0xf   :  { %607 = vsyncadd [#allocation3], 4294967232 }
  0x10   :  { %608 = dma.done.wait [#allocation6], 2048  }
  0x11   :  { %609 = vsyncadd [#allocation6], 4294965248 }
  0x12   :  { %610 = dma.done.wait [#allocation9], 1024  }
  0x13   :  { %611 = vsyncadd [#allocation9], 4294966272  ;;  %v459_v0 = vld [vmem:[#allocation5 + $0x38] sm:$0xff]  ;;  %v458_v1 = vld [vmem:[#allocation5 + $0x30] sm:$0xff]  ;;  %s620_s24 = smov [#allocation10]   ;;  %s344_s28 = sshll.u32 %s692_s7, 4  ;;  %s345_s28 = int_to_ptr.hbm [resolvable:$true] %s344_s28 }
  0x14   :  { %157 = vmatpush.bf16.msra.mxu0 %v459_v0  ;;  %v467_v2 = vld [vmem:[#allocation7 + $0x38] sm:$0xff]  ;;  %v466_v3 = vld [vmem:[#allocation7 + $0x30] sm:$0xff]  ;;  %v457_v4 = vld [vmem:[#allocation5 + $0x28] sm:$0xff]  ;;  %s342_s25 = sshll.u32 %s620_s24, 4  ;;  %s343_s25 = int_to_ptr.vmem [resolvable:$true] %s342_s25 }
  0x15   :  { %240 = vmatpush.bf16.msra.mxu1 %v467_v2  ;;  %v465_v5 = vld [vmem:[#allocation7 + $0x28] sm:$0xff]  ;;  %v456_v6 = vld [vmem:[#allocation5 + $0x20] sm:$0xff]  ;;  %v455_v8 = vld [vmem:[#allocation5 + $0x18] sm:$0xff] }
  0x16   :  { %v464_v7 = vld [vmem:[#allocation7 + $0x20] sm:$0xff]  ;;  %v463_v9 = vld [vmem:[#allocation7 + $0x18] sm:$0xff]  ;;  %v454_v10 = vld [vmem:[#allocation5 + $0x10] sm:$0xff] }
  0x17   :  { %v462_v11 = vld [vmem:[#allocation7 + $0x10] sm:$0xff]  ;;  %v453_v12 = vld [vmem:[#allocation5 + $0x8] sm:$0xff]  ;;  %v452_v13 = vld [vmem:[#allocation5] sm:$0xff] }
  0x18   :  { %158 = vmatpush.bf16.msra.mxu0 %v458_v1  ;;  %v88_v14 = vld [vmem:[#allocation2] sm:$0xf]  ;;  %v461_v15 = vld [vmem:[#allocation7 + $0x8] sm:$0xff]  ;;  %v460_v16 = vld [vmem:[#allocation7] sm:$0xff] }
  0x19   :  { %241 = vmatpush.bf16.msra.mxu1 %v466_v3  ;;  %v475_v17 = vld [vmem:[#allocation8 + $0x38] sm:$0xff]  ;;  %v474_v18 = vld [vmem:[#allocation8 + $0x30] sm:$0xff]  ;;  %v473_v19 = vld [vmem:[#allocation8 + $0x28] sm:$0xff] }
  0x1a   :  { %323 = vmatpush.bf16.msra.mxu2 %v475_v17  ;;  %v472_v20 = vld [vmem:[#allocation8 + $0x20] sm:$0xff]  ;;  %v471_v21 = vld [vmem:[#allocation8 + $0x18] sm:$0xff]  ;;  %v470_v22 = vld [vmem:[#allocation8 + $0x10] sm:$0xff] }
  0x1b   :  { %v483_v23 = vld [vmem:[%s687_s2] ss:$0 sm:$0xff]  ;;  %v469_v29 = vld [vmem:[#allocation8 + $0x8] sm:$0xff]  ;;  %v468_v30 = vld [vmem:[#allocation8] sm:$0xff] }
  0x1c   :  { %159 = vmatpush.bf16.msra.mxu0 %v457_v4  ;;  %v484_v31 = vld [vmem:[%s689_s4] ss:$0 sm:$0xff] }
  0x1d   :  { %242 = vmatpush.bf16.msra.mxu1 %v465_v5  ;;  %v485_v37 = vld [vmem:[%s691_s6] ss:$0 sm:$0xff] }
  0x1e   :  { %324 = vmatpush.bf16.msra.mxu2 %v474_v18 }
  0x20   :  { %160 = vmatpush.bf16.msra.mxu0 %v456_v6 }
  0x21   :  { %243 = vmatpush.bf16.msra.mxu1 %v464_v7 }
  0x22   :  { %325 = vmatpush.bf16.msra.mxu2 %v473_v19 }
  0x24   :  { %161 = vmatpush.bf16.msra.mxu0 %v455_v8 }
  0x25   :  { %244 = vmatpush.bf16.msra.mxu1 %v463_v9 }
  0x26   :  { %326 = vmatpush.bf16.msra.mxu2 %v472_v20 }
  0x28   :  { %162 = vmatpush.bf16.msra.mxu0 %v454_v10 }
  0x29   :  { %245 = vmatpush.bf16.msra.mxu1 %v462_v11 }
  0x2a   :  { %327 = vmatpush.bf16.msra.mxu2 %v471_v21 }
  0x2c   :  { %163 = vmatpush.bf16.msra.mxu0 %v453_v12 }
  0x2d   :  { %246 = vmatpush.bf16.msra.mxu1 %v461_v15 }
  0x2e   :  { %328 = vmatpush.bf16.msra.mxu2 %v470_v22 }
  0x30   :  { %164 = vmatpush.bf16.msra.mxu0 %v452_v13 }
  0x31   :  { %247 = vmatpush.bf16.msra.mxu1 %v460_v16 }
  0x32   :  { %329 = vmatpush.bf16.msra.mxu2 %v469_v29 }
  0x33   :  { %165 = vmatmul.bf16.vlgmr.msra.gmra.mxu0 %v88_v14 }
  0x36   :  { %330 = vmatpush.bf16.msra.mxu2 %v468_v30 }
  0xb0   :  { %v166_v24 = vpop.f32.mrf.mxu0 }
  0xb1   :  { %v167_v25 = vadd.f32 %v483_v23, %v166_v24 }
  0xb3   :  { %v170_v26 = vmax.f32 %v167_v25, 0.0 }
  0xb5   :  { %v171_v27 = vpack.c.bf16 %v170_v26, %v170_v26 }
  0xb7   :  { %248 = vmatmul.bf16.vlgmr.msra.gmra.mxu1 %v171_v27 }
  0xb8   :  { %v168_v28 = vpop.f32.mrf.mxu0 }
 0x134   :  { %v249_v32 = vpop.f32.mrf.mxu1 }
 0x135   :  { %v250_v33 = vadd.f32 %v484_v31, %v249_v32 }
 0x137   :  { %v253_v34 = vmax.f32 %v250_v33, 0.0 }
 0x139   :  { %v254_v35 = vpack.c.bf16 %v253_v34, %v253_v34 }
 0x13b   :  { %331 = vmatmul.bf16.vlgmr.msra.gmra.mxu2 %v254_v35 }
 0x13c   :  { %v251_v36 = vpop.f32.mrf.mxu1 }
 0x1be   :  { %v332_v38 = vpop.f32.mrf.mxu2 }
 0x1bf   :  { %v333_v39 = vadd.f32 %v485_v37, %v332_v38 }
 0x1c1   :  { %336 = vst [vmem:[#allocation10] sm:$0xff] %v333_v39 }
 0x1c2   :  { %347 = dma.vmem_to_hbm [thread:$0]  %s343_s25, 128, %s345_s28, [#allocation4]  }
 0x1c6   :  { %v334_v40 = vpop.f32.mrf.mxu2 }
 0x1c7   :  { %612 = dma.done.wait [#allocation4], 128  }
 0x1c8   :  { %613 = vsyncadd [#allocation4], 4294967168 }
 0x1c9   :  { %352 = vsyncpa [#allocation3], 1 }
 0x1ca   :  { %353 = vsyncpa [#allocation6], 1 }
 0x1cb   :  { %354 = vsyncpa [#allocation9], 1 }
 0x1cc   :  { %355 = vsyncpa [#allocation4], 1 }

</bundles_post_ra>
